<compile_context>
chip_gen: v6e
topology: v6e:2x2x1
jax: 0.10.0
libtpu: 0.0.40
codegen_flags: <defaults>
</compile_context>

<pallas_src>
import math

import jax
import jax.numpy as jnp
from jax.experimental import pallas as pl
from jax.experimental.pallas import tpu as pltpu

VALUE_FACTOR = 0.5
ENTROPY_FACTOR = 0.01  # present in the module but unused in forward

SUBLANES = 8


def _tpu_generation():
    """Best-effort TPU generation detection (None if unknown / not TPU)."""
    try:
        kind = jax.devices()[0].device_kind.lower()
    except Exception:
        return None
    for gen in (7, 6, 5, 4):
        if ("v%d" % gen) in kind or ("tpu%d" % gen) in kind:
            return gen
    return None


def _make_kernel(ncores, steps, tile_rows, lanes, rows, ragged):
    """Build the loss-reduction kernel for a fixed (static) tiling."""

    def kernel(p_ref, v_ref, r_ref, acc_ref):
        if ncores > 1:
            core = pl.program_id(0)
            step = pl.program_id(1)
            block = core * steps + step
        else:
            step = pl.program_id(0)
            block = step

        @pl.when(step == 0)
        def _init():
            acc_ref[...] = jnp.zeros_like(acc_ref)

        p = p_ref[...]
        v = v_ref[...]
        r = r_ref[...]
        # Upcast only if needed (no-op for f32; lets bf16 inputs halve HBM traffic).
        if p.dtype != jnp.float32:
            p = p.astype(jnp.float32)
        if v.dtype != jnp.float32:
            v = v.astype(jnp.float32)
        if r.dtype != jnp.float32:
            r = r.astype(jnp.float32)

        adv = r - v
        neg_log_p = -jnp.log(jnp.clip(p, 1e-8, 1.0 - 1e-8))

        sq_full = adv * adv
        pg_full = neg_log_p * adv

        if ragged:
            # Mask out-of-range rows (last partial block / clamped duplicate
            # blocks).  Cheap VPU compare+selects; also squashes any NaN that
            # the unspecified out-of-bounds data could produce.
            row_ids = block * tile_rows + jax.lax.broadcasted_iota(
                jnp.int32, (tile_rows, lanes), 0)
            valid = row_ids < rows
            sq_full = jnp.where(valid, sq_full, 0.0)
            pg_full = jnp.where(valid, pg_full, 0.0)

        # Reduce only the leading row-group axis (pure VPU vreg adds, no XLU);
        # keep per-(sublane, lane) partial sums in the resident output slab.
        sq = jnp.sum(sq_full.reshape(tile_rows // SUBLANES, SUBLANES, lanes), axis=0)
        pg = jnp.sum(pg_full.reshape(tile_rows // SUBLANES, SUBLANES, lanes), axis=0)

        acc_ref[0] += sq
        acc_ref[1] += pg

    return kernel


def custom_loss(policy_per_action, values, discounted_rewards, *, use_pallas=None):
    """Returns (loss, policy_loss, value_loss) as float32 scalars."""
    assert policy_per_action.shape == values.shape == discounted_rewards.shape
    total = int(math.prod(policy_per_action.shape))

    # Small-input fast path: pallas_call fixed cost dominates for tiny tensors.
    if use_pallas is None:
        use_pallas = total >= (1 << 15)
    if not use_pallas:
        adv = (discounted_rewards.astype(jnp.float32)
               - values.astype(jnp.float32))
        nlp = -jnp.log(jnp.clip(policy_per_action.astype(jnp.float32),
                                1e-8, 1.0 - 1e-8))
        value_loss = jnp.mean(adv * adv)
        policy_loss = jnp.mean(nlp * adv)
        return policy_loss + VALUE_FACTOR * value_loss, policy_loss, value_loss

    gen = _tpu_generation()
    ncores = 2 if gen == 7 else 1                 # only v7x has 2 TCs/chip
    max_tile_rows = 1024 if gen in (6, 7) else 512

    p = policy_per_action.reshape(-1)
    v = values.reshape(-1)
    r = discounted_rewards.reshape(-1)

    # Pick a lane width that divides total so the reshape is copy-free.
    lanes = None
    for cand in (512, 256, 128):
        if total % cand == 0:
            lanes = cand
            break
    if lanes is None:
        # Pad only the final partial lane row (padded advantage == 0 and
        # p == 0.5, so padding contributes exactly zero to both sums).
        lanes = 512
        pad = (-total) % lanes
        p = jnp.concatenate([p, jnp.full((pad,), 0.5, p.dtype)])
        v = jnp.concatenate([v, jnp.zeros((pad,), v.dtype)])
        r = jnp.concatenate([r, jnp.zeros((pad,), r.dtype)])
    rows = p.shape[0] // lanes

    p2 = p.reshape(rows, lanes)
    v2 = v.reshape(rows, lanes)
    r2 = r.reshape(rows, lanes)

    # Row tile: multiple of 8 sublanes, capped by the generation-aware max.
    tile_rows = min(max_tile_rows, -(-rows // SUBLANES) * SUBLANES)
    if rows < tile_rows:
        # Small input: pad a handful of rows (cheap; keeps block <= array and
        # the in-kernel reshape on an 8-aligned tile).  Padding contributes 0.
        extra = tile_rows - rows
        p2 = jnp.concatenate([p2, jnp.full((extra, lanes), 0.5, p2.dtype)], axis=0)
        v2 = jnp.concatenate([v2, jnp.zeros((extra, lanes), v2.dtype)], axis=0)
        r2 = jnp.concatenate([r2, jnp.zeros((extra, lanes), r2.dtype)], axis=0)
        rows = tile_rows

    total_blocks = -(-rows // tile_rows)
    if ncores > 1 and total_blocks < 2:
        ncores = 1
    steps = -(-total_blocks // ncores)
    n_grid_blocks = ncores * steps
    need_clamp = n_grid_blocks != total_blocks
    ragged = (tile_rows * total_blocks != rows) or need_clamp
    last_block = total_blocks - 1

    if ncores > 1:
        if need_clamp:
            in_idx = lambda c, i: (jnp.minimum(c * steps + i, last_block), 0)
        else:
            in_idx = lambda c, i: (c * steps + i, 0)
        out_idx = lambda c, i: (c, 0, 0)
        dims = (getattr(pltpu, "CORE_PARALLEL", "parallel"),
                getattr(pltpu, "ARBITRARY", "arbitrary"))
        grid = (ncores, steps)
    else:
        in_idx = lambda i: (i, 0)
        out_idx = lambda i: (0, 0, 0)
        dims = ("arbitrary",)
        grid = (steps,)

    in_spec = pl.BlockSpec((tile_rows, lanes), in_idx)
    out_spec = pl.BlockSpec((2, SUBLANES, lanes), out_idx)

    itemsize = jnp.dtype(p2.dtype).itemsize
    out_bytes = ncores * 2 * SUBLANES * lanes * 4
    bytes_accessed = 3 * rows * lanes * itemsize + out_bytes

    kernel = _make_kernel(ncores, steps, tile_rows, lanes, rows, ragged)

    partials = pl.pallas_call(
        kernel,
        out_shape=jax.ShapeDtypeStruct((ncores * 2, SUBLANES, lanes), jnp.float32),
        grid_spec=pltpu.PrefetchScalarGridSpec(
            num_scalar_prefetch=0,
            grid=grid,
            in_specs=[in_spec, in_spec, in_spec],
            out_specs=out_spec,
        ),
        compiler_params=pltpu.CompilerParams(dimension_semantics=dims),
        cost_estimate=pl.CostEstimate(
            flops=9 * total,
            transcendentals=total,
            bytes_accessed=bytes_accessed),
    )(p2, v2, r2)

    # Final cross-core / cross-sublane / cross-lane reduction on a tiny slab.
    sums = jnp.sum(partials.reshape(ncores, 2, SUBLANES, lanes), axis=(0, 2, 3))
    value_loss = sums[0] / total
    policy_loss = sums[1] / total
    loss = policy_loss + VALUE_FACTOR * value_loss
    return loss, policy_loss, value_loss


def _reference(policy, values, rewards):
    adv = rewards - values
    clipped = jnp.clip(policy, 1e-8, 1.0 - 1e-8)
    value_loss = jnp.mean(adv ** 2)
    policy_loss = jnp.mean(-jnp.log(clipped) * adv)
    return policy_loss + VALUE_FACTOR * value_loss, policy_loss, value_loss


if __name__ == "__main__":
    key = jax.random.PRNGKey(0)
    k1, k2, k3 = jax.random.split(key, 3)

    B, N = 32, 128  # small shapes consistent with (batch, actions) inputs
    policy = jax.random.uniform(k1, (B, N), jnp.float32, minval=0.01, maxval=0.99)
    values = jax.random.normal(k2, (B, N), jnp.float32)
    rewards = jax.random.normal(k3, (B, N), jnp.float32)

    # Force the Pallas path so the kernel is exercised even at this small size.
    loss, policy_loss, value_loss = custom_loss(policy, values, rewards,
                                                use_pallas=True)
    jax.block_until_ready((loss, policy_loss, value_loss))

    ref_loss, ref_pol, ref_val = _reference(policy, values, rewards)
    assert jnp.allclose(loss, ref_loss, rtol=1e-5, atol=1e-5)
    assert jnp.allclose(policy_loss, ref_pol, rtol=1e-5, atol=1e-5)
    assert jnp.allclose(value_loss, ref_val, rtol=1e-5, atol=1e-5)

    print("KERNEL_OK")
</pallas_src>

<mosaic_0001>
module attributes {stable_mosaic.version = 11 : i64} {
  func.func @kernel(%arg0: i32, %arg1: memref<8x512xf32, #tpu.memory_space<vmem>>, %arg2: memref<8x512xf32, #tpu.memory_space<vmem>>, %arg3: memref<8x512xf32, #tpu.memory_space<vmem>>, %arg4: memref<2x8x512xf32, #tpu.memory_space<vmem>>) attributes {dimension_semantics = [#tpu.dimension_semantics<arbitrary>], iteration_bounds = array<i64: 1>, scalar_prefetch = 0 : i64, scratch_operands = 0 : i64, tpu.core_type = #tpu.core_type<tc>, window_params = [{transform_indices = @transform_0, window_bounds = array<i64: 8, 512>}, {transform_indices = @transform_1, window_bounds = array<i64: 8, 512>}, {transform_indices = @transform_2, window_bounds = array<i64: 8, 512>}, {pipeline_mode = #tpu.pipeline_mode<synchronous>, transform_indices = @transform_3, window_bounds = array<i64: 2, 8, 512>}]} {
    %c0_i32 = arith.constant 0 : i32
    %0 = arith.cmpi eq, %arg0, %c0_i32 : i32
    %1 = arith.extui %0 : i1 to i32
    %c0_i32_0 = arith.constant 0 : i32
    %2 = arith.cmpi ne, %1, %c0_i32_0 : i32
    scf.if %2 {
      %cst_21 = arith.constant 0.000000e+00 : f32
      %32 = vector.broadcast %cst_21 : f32 to vector<2x8x512xf32>
      %c0_22 = arith.constant 0 : index
      %c0_23 = arith.constant 0 : index
      %c0_24 = arith.constant 0 : index
      %33 = vector.load %arg4[%c0_22, %c0_23, %c0_24] : memref<2x8x512xf32, #tpu.memory_space<vmem>>, vector<2x8x512xf32>
      tpu.vector_store %arg4[%c0_22, %c0_23, %c0_24], %32 {strides = array<i32>} : memref<2x8x512xf32, #tpu.memory_space<vmem>>, vector<2x8x512xf32>,
    } else {
    }
    %c0 = arith.constant 0 : index
    %c0_1 = arith.constant 0 : index
    %3 = vector.load %arg1[%c0, %c0_1] : memref<8x512xf32, #tpu.memory_space<vmem>>, vector<8x512xf32>
    %c0_2 = arith.constant 0 : index
    %c0_3 = arith.constant 0 : index
    %4 = vector.load %arg2[%c0_2, %c0_3] : memref<8x512xf32, #tpu.memory_space<vmem>>, vector<8x512xf32>
    %c0_4 = arith.constant 0 : index
    %c0_5 = arith.constant 0 : index
    %5 = vector.load %arg3[%c0_4, %c0_5] : memref<8x512xf32, #tpu.memory_space<vmem>>, vector<8x512xf32>
    %6 = arith.subf %5, %4 : vector<8x512xf32>
    %cst = arith.constant 9.99999993E-9 : f32
    %cst_6 = arith.constant 1.000000e+00 : f32
    %7 = vector.broadcast %cst : f32 to vector<8x512xf32>
    %8 = arith.maximumf %7, %3 : vector<8x512xf32>
    %9 = vector.broadcast %cst_6 : f32 to vector<8x512xf32>
    %10 = arith.minimumf %9, %8 : vector<8x512xf32>
    %11 = math.log %10 : vector<8x512xf32>
    %cst_7 = arith.constant 0.000000e+00 : f32
    %12 = vector.broadcast %cst_7 : f32 to vector<8x512xf32>
    %13 = arith.subf %12, %11 : vector<8x512xf32>
    %14 = arith.mulf %6, %6 : vector<8x512xf32>
    %15 = arith.mulf %13, %6 : vector<8x512xf32>
    %16 = vector.shape_cast %14 : vector<8x512xf32> to vector<1x8x512xf32>
    %cst_8 = arith.constant dense<0.000000e+00> : vector<8x512xf32>
    %17 = vector.multi_reduction <add>, %16, %cst_8 [0] : vector<1x8x512xf32> to vector<8x512xf32>
    %18 = vector.shape_cast %15 : vector<8x512xf32> to vector<1x8x512xf32>
    %cst_9 = arith.constant dense<0.000000e+00> : vector<8x512xf32>
    %19 = vector.multi_reduction <add>, %18, %cst_9 [0] : vector<1x8x512xf32> to vector<8x512xf32>
    %c0_10 = arith.constant 0 : index
    %c0_11 = arith.constant 0 : index
    %c0_12 = arith.constant 0 : index
    %20 = vector.load %arg4[%c0_10, %c0_11, %c0_12] : memref<2x8x512xf32, #tpu.memory_space<vmem>>, vector<1x8x512xf32>
    %21 = vector.shape_cast %20 : vector<1x8x512xf32> to vector<8x512xf32>
    %22 = arith.addf %21, %17 : vector<8x512xf32>
    %c0_13 = arith.constant 0 : index
    %c0_14 = arith.constant 0 : index
    %c0_15 = arith.constant 0 : index
    %23 = vector.load %arg4[%c0_13, %c0_14, %c0_15] : memref<2x8x512xf32, #tpu.memory_space<vmem>>, vector<1x8x512xf32>
    %24 = vector.shape_cast %23 : vector<1x8x512xf32> to vector<8x512xf32>
    %25 = vector.shape_cast %22 : vector<8x512xf32> to vector<1x8x512xf32>
    tpu.vector_store %arg4[%c0_13, %c0_14, %c0_15], %25 {strides = array<i32>} : memref<2x8x512xf32, #tpu.memory_space<vmem>>, vector<1x8x512xf32>,
    %c1 = arith.constant 1 : index
    %c0_16 = arith.constant 0 : index
    %c0_17 = arith.constant 0 : index
    %26 = vector.load %arg4[%c1, %c0_16, %c0_17] : memref<2x8x512xf32, #tpu.memory_space<vmem>>, vector<1x8x512xf32>
    %27 = vector.shape_cast %26 : vector<1x8x512xf32> to vector<8x512xf32>
    %28 = arith.addf %27, %19 : vector<8x512xf32>
    %c1_18 = arith.constant 1 : index
    %c0_19 = arith.constant 0 : index
    %c0_20 = arith.constant 0 : index
    %29 = vector.load %arg4[%c1_18, %c0_19, %c0_20] : memref<2x8x512xf32, #tpu.memory_space<vmem>>, vector<1x8x512xf32>
    %30 = vector.shape_cast %29 : vector<1x8x512xf32> to vector<8x512xf32>
    %31 = vector.shape_cast %28 : vector<8x512xf32> to vector<1x8x512xf32>
    tpu.vector_store %arg4[%c1_18, %c0_19, %c0_20], %31 {strides = array<i32>} : memref<2x8x512xf32, #tpu.memory_space<vmem>>, vector<1x8x512xf32>,
    return
  }
  func.func @transform_0(%arg0: i32) -> (i32, i32) {
    %c0_i32 = arith.constant 0 : i32
    %c0_i32_0 = arith.constant 0 : i32
    return %arg0, %c0_i32 : i32, i32
  }
  func.func @transform_1(%arg0: i32) -> (i32, i32) {
    %c0_i32 = arith.constant 0 : i32
    %c0_i32_0 = arith.constant 0 : i32
    return %arg0, %c0_i32 : i32, i32
  }
  func.func @transform_2(%arg0: i32) -> (i32, i32) {
    %c0_i32 = arith.constant 0 : i32
    %c0_i32_0 = arith.constant 0 : i32
    return %arg0, %c0_i32 : i32, i32
  }
  func.func @transform_3(%arg0: i32) -> (i32, i32, i32) {
    %c0_i32 = arith.constant 0 : i32
    %c0_i32_0 = arith.constant 0 : i32
    %c0_i32_1 = arith.constant 0 : i32
    %c0_i32_2 = arith.constant 0 : i32
    return %c0_i32, %c0_i32_0, %c0_i32_1 : i32, i32, i32
  }
}

</mosaic_0001>

<bundles_post_ra>
// kernel: tpu_custom_call.1
= control target key start
LH: loop header
LB: loop body
LE: loop exit
PB: predicated region body
PF: predicated region fallthrough
CT: control target
= control target key end

     0   :  { %8 = vsyncpa [#allocation3], 0  ;;  %s296_s0 = inlined_call_operand.hbm [shape: f32[8,512], index: 0, kind: input, shape index: {}]   ;;  %s297_s1 = inlined_call_operand.hbm [shape: f32[8,512], index: 1, kind: input, shape index: {}]   ;;  %s298_s2 = inlined_call_operand.hbm [shape: f32[8,512], index: 2, kind: input, shape index: {}]   ;;  %s299_s3 = inlined_call_operand.hbm [shape: f32[2,8,512], index: 3, kind: output, shape index: {}]  }
   0x1   :  { %9 = vsyncpa [#allocation6], 0 }
   0x2   :  { %10 = vsyncpa [#allocation4], 0  ;;  %s258_s12 = smov [#allocation5]   ;;  %s259_s14 = smov [#allocation2]  }
   0x3   :  { %s27_s13 = sshll.u32 %s258_s12, 4  ;;  %s17_s15 = sshll.u32 %s259_s14, 4  ;;  %s28_s13 = int_to_ptr.vmem [resolvable:$true] %s27_s13  ;;  %s18_s15 = int_to_ptr.vmem [resolvable:$true] %s17_s15 }
   0x4   :  { %s180_s16 = scalar_lea.vmem %s28_s13, 512  ;;  %p185_p1 = scmp.lt.s32.totalorder %s28_s13, %s28_s13 }
   0x5   :  { %p181_p0 = scmp.ne.s32.totalorder %s28_s13, %s180_s16  ;;  %p186_p2 = scmp.lt.s32.totalorder %s180_s16, %s180_s16 }
   0x7   :  { %p187_p3 = por %p186_p2, %p185_p1 }
   0x9   :  { %p188_p4 = pnand %p187_p3, %p181_p0 }
   0xb   :  { %191 = shalt.err (!%p188_p4)
}
   0xc   :  { %30 = dma.hbm_to_vmem [thread:$0]  %s297_s1, 512, %s28_s13, [#allocation6]  }
   0xd   :  { %s200_s19 = scalar_lea.vmem %s18_s15, 512  ;;  %p205_p6 = scmp.lt.s32.totalorder %s18_s15, %s18_s15 }
   0xe   :  { %p201_p5 = scmp.ne.s32.totalorder %s18_s15, %s200_s19  ;;  %p206_p7 = scmp.lt.s32.totalorder %s200_s19, %s200_s19 }
  0x10   :  { %p207_p8 = por %p206_p7, %p205_p6 }
  0x12   :  { %p208_p9 = pnand %p207_p8, %p201_p5 }
  0x14   :  { %211 = shalt.err (!%p208_p9)
}
  0x15   :  { %20 = dma.hbm_to_vmem [thread:$0]  %s296_s0, 512, %s18_s15, [#allocation3]  }
  0x16   :  { %s260_s22 = smov [#allocation7]  }
  0x17   :  { %s37_s23 = sshll.u32 %s260_s22, 4  ;;  %s38_s23 = int_to_ptr.vmem [resolvable:$true] %s37_s23 }
  0x18   :  { %s220_s24 = scalar_lea.vmem %s38_s23, 512  ;;  %p225_p11 = scmp.lt.s32.totalorder %s38_s23, %s38_s23 }
  0x19   :  { %p221_p10 = scmp.ne.s32.totalorder %s38_s23, %s220_s24  ;;  %p226_p12 = scmp.lt.s32.totalorder %s220_s24, %s220_s24 }
  0x1b   :  { %p227_p13 = por %p226_p12, %p225_p11 }
  0x1d   :  { %p228_p0 = pnand %p227_p13, %p221_p10 }
  0x1f   :  { %231 = shalt.err (!%p228_p0)
}
  0x20   :  { %40 = dma.hbm_to_vmem [thread:$0]  %s298_s2, 512, %s38_s23, [#allocation6]  }
  0x21   :  { %252 = dma.done.wait [#allocation3], 512  }
  0x22   :  { %253 = vsyncadd [#allocation3], 4294966784 }
  0x23   :  { %254 = dma.done.wait [#allocation6], 1024  }
  0x24   :  { %255 = vsyncadd [#allocation6], 4294966272  ;;  %v66_v0 = vld [vmem:[#allocation5] sm:$0xff]  ;;  %v67_v2 = vld [vmem:[#allocation5 + $0x8] sm:$0xff]  ;;  %s261_s0 = smov [#allocation8]  }
  0x25   :  { %v70_v1 = vld [vmem:[#allocation7] sm:$0xff]  ;;  %v71_v4 = vld [vmem:[#allocation7 + $0x8] sm:$0xff]  ;;  %v68_v5 = vld [vmem:[#allocation5 + $0x10] sm:$0xff]  ;;  %s144_s2 = sshll.u32 %s261_s0, 4  ;;  %s145_s2 = int_to_ptr.vmem [resolvable:$true] %s144_s2 }
  0x26   :  { %v74_v3 = vsub.f32 %v70_v1, %v66_v0  ;;  %v72_v6 = vld [vmem:[#allocation7 + $0x10] sm:$0xff]  ;;  %v75_v7 = vsub.f32 %v71_v4, %v67_v2  ;;  %v69_v9 = vld [vmem:[#allocation5 + $0x18] sm:$0xff]  ;;  %v62_v11 = vld [vmem:[#allocation2] sm:$0xff]  ;;  %s232_s26 = scalar_lea.vmem %s145_s2, 1024  ;;  %p237_p2 = scmp.lt.s32.totalorder %s145_s2, %s145_s2 }
  0x27   :  { %v76_v8 = vsub.f32 %v72_v6, %v68_v5  ;;  %v73_v10 = vld [vmem:[#allocation7 + $0x18] sm:$0xff]  ;;  %v78_v14 = vmax.f32 %v62_v11, 1e-08  ;;  %v63_v15 = vld [vmem:[#allocation2 + $0x8] sm:$0xff]  ;;  %v64_v16 = vld [vmem:[#allocation2 + $0x10] sm:$0xff]  ;;  %p233_p1 = scmp.ne.s32.totalorder %s145_s2, %s232_s26  ;;  %p238_p3 = scmp.lt.s32.totalorder %s232_s26, %s232_s26 }
  0x28   :  { %v98_v12 = vmul.f32 %v74_v3, %v74_v3  ;;  %v77_v13 = vsub.f32 %v73_v10, %v69_v9  ;;  %v65_v17 = vld [vmem:[#allocation2 + $0x18] sm:$0xff]  ;;  %v99_v18 = vmul.f32 %v75_v7, %v75_v7  ;;  %v79_v20 = vmax.f32 %v63_v15, 1e-08 }
  0x29   :  { %v100_v19 = vmul.f32 %v76_v8, %v76_v8  ;;  %v80_v21 = vmax.f32 %v64_v16, 1e-08  ;;  %v82_v23 = vmin.f32 %v78_v14, 1.0  ;;  %v81_v24 = vmax.f32 %v65_v17, 1e-08  ;;  %p239_p4 = por %p238_p3, %p237_p2 }
  0x2a   :  { %v101_v22 = vmul.f32 %v77_v13, %v77_v13  ;;  %v83_v25 = vmin.f32 %v79_v20, 1.0  ;;  %122 = vst [vmem:[#allocation8] sm:$0xff] %v98_v12  ;;  %123 = vst [vmem:[#allocation8 + $0x8] sm:$0xff] %v99_v18 }
  0x2b   :  { %v84_v26 = vmin.f32 %v80_v21, 1.0  ;;  %164 = vlog2.f32 %v82_v23  ;;  %v85_v27 = vmin.f32 %v81_v24, 1.0  ;;  %124 = vst [vmem:[#allocation8 + $0x10] sm:$0xff] %v100_v19  ;;  %p240_p5 = pnand %p239_p4, %p233_p1 }
  0x2c   :  { %166 = vlog2.f32 %v83_v25  ;;  %125 = vst [vmem:[#allocation8 + $0x18] sm:$0xff] %v101_v22 }
  0x2d   :  { %168 = vlog2.f32 %v84_v26 }
  0x2e   :  { %170 = vlog2.f32 %v85_v27 }
  0x38   :  { %v165_v28 = vpop.eup %164 }
  0x39   :  { %v167_v29 = vpop.eup %166  ;;  %v87_v30 = vmul.f32 0.6931472, %v165_v28 }
  0x3a   :  { %v169_v31 = vpop.eup %168  ;;  %v89_v32 = vmul.f32 0.6931472, %v167_v29 }
  0x3b   :  { %v171_v33 = vpop.eup %170  ;;  %v94_v34 = vsub.f32 0.0, %v87_v30  ;;  %v91_v35 = vmul.f32 0.6931472, %v169_v31 }
  0x3c   :  { %v95_v36 = vsub.f32 0.0, %v89_v32  ;;  %v93_v37 = vmul.f32 0.6931472, %v171_v33 }
  0x3d   :  { %v102_v38 = vmul.f32 %v94_v34, %v74_v3  ;;  %v96_v39 = vsub.f32 0.0, %v91_v35 }
  0x3e   :  { %v103_v40 = vmul.f32 %v95_v36, %v75_v7  ;;  %v97_v41 = vsub.f32 0.0, %v93_v37 }
  0x3f   :  { %v104_v42 = vmul.f32 %v96_v39, %v76_v8  ;;  %135 = vst [vmem:[#allocation8 + $0x20] sm:$0xff] %v102_v38 }
  0x40   :  { %v105_v43 = vmul.f32 %v97_v41, %v77_v13  ;;  %136 = vst [vmem:[#allocation8 + $0x28] sm:$0xff] %v103_v40 }
  0x41   :  { %137 = vst [vmem:[#allocation8 + $0x30] sm:$0xff] %v104_v42 }
  0x42   :  { %138 = vst [vmem:[#allocation8 + $0x38] sm:$0xff] %v105_v43 }
  0x43   :  { %243 = shalt.err (!%p240_p5)
}
  0x44   :  { %s262_s27 = smov 512   ;;  %s263_s28 = smov 32  }
  0x45   :  { %150 = dma.vmem_to_hbm [thread:$0]  %s145_s2, 1024, %s299_s3, [#allocation4], %s262_s27, %s262_s27, %s263_s28  }
  0x46   :  { %256 = dma.done.wait [#allocation4], 1024  }
  0x47   :  { %257 = vsyncadd [#allocation4], 4294966272 }
  0x48   :  { %154 = vsyncpa [#allocation3], 1 }
  0x49   :  { %155 = vsyncpa [#allocation6], 1 }
  0x4a   :  { %156 = vsyncpa [#allocation4], 1 }

</bundles_post_ra>
